<compile_context>
chip_gen: v7x
topology: tpu7x:2x2x1
jax: 0.10.0
libtpu: 0.0.40
codegen_flags: <defaults>
</compile_context>

<pallas_src>
import functools

import jax
import jax.numpy as jnp
from jax.experimental import pallas as pl
from jax.experimental.pallas import tpu as pltpu


_SMALL_K_MAX = 16  # dense-plane VPU kernel up to this many classes, MXU above


def _pick_tile(total, target, quantum, prefer_even_tiles):
    """Choose a tile size along one axis.

    Returns (tile, n_tiles, padded_total).  `tile` is a multiple of `quantum`
    unless it equals the full (unpadded) extent.  padded_total == total unless
    no exact tiling exists, in which case the wrapper pads in HBM (rare).
    """
    target = max(quantum, (target // quantum) * quantum)
    if total <= target:
        if (prefer_even_tiles and total >= 2 * quantum
                and total % (2 * quantum) == 0):
            return total // 2, 2, total          # keep both v7x TCs busy
        return total, 1, total
    cands = [t for t in range(quantum, target + 1, quantum) if total % t == 0]
    if cands:
        if prefer_even_tiles:
            even = [t for t in cands if (total // t) % 2 == 0]
            if even:
                t = max(even)
                return t, total // t, total
        t = max(cands)
        return t, total // t, total
    # TODO(synk): mask the ragged tail in-kernel (SMEM scalar + masked store)
    # instead of materializing a padded copy in HBM.
    n_tiles = max(1, -(-total // target))
    if prefer_even_tiles and (n_tiles % 2):
        n_tiles += 1
    per = -(-total // n_tiles)
    tile = -(-per // quantum) * quantum
    return tile, n_tiles, tile * n_tiles


def _compiler_params(vmem_est_bytes):
    kwargs = dict(dimension_semantics=("parallel", "parallel"))
    if vmem_est_bytes > (16 << 20):
        # Never request more than 48 MiB: stays under v7x's 64 MiB physical
        # VMEM with headroom for Mosaic's internal scratch.
        kwargs["vmem_limit_bytes"] = int(min(int(1.5 * vmem_est_bytes), 48 << 20))
    return pltpu.CompilerParams(**kwargs)


def _fusion_kernel_smallk(cm_ref, prior_ref, current_ref, out_ref, *,
                          n_classes, fusion_type):
    """cm_ref: SMEM (K*K,) f32; prior/current/out refs: VMEM (1, K, TS, 128).

    All arithmetic runs on dense (TS, 128) class planes (full 8x128 vregs,
    lane-dense unmasked stores).  The K x K matvec is unrolled into scalar-
    broadcast FMAs accumulated per class plane -- no (K, TM) concatenate and
    no cross-sublane reduce.
    """
    K = n_classes
    p = [prior_ref[0, j].astype(jnp.float32) for j in range(K)]    # (TS, 128)
    q = [current_ref[0, j].astype(jnp.float32) for j in range(K)]  # (TS, 128)

    def matvec(x, transpose=False):
        # y[i] = sum_j C[i, j] * x[j]   (C[j, i] if transpose); per-plane accum.
        ys = []
        for i in range(K):
            acc = None
            for j in range(K):
                c_ij = cm_ref[(j * K + i) if transpose else (i * K + j)]
                term = c_ij * x[j]
                acc = term if acc is None else acc + term
            ys.append(acc)
        return ys

    if fusion_type == "bayes":
        # prior and current L1 normalizations both cancel in the final renorm.
        lik = matvec(q)                               # lik[i] = Σ_j C[i,j] q[j]
        u = [p[i] * lik[i] for i in range(K)]
        s = u[0]
        for i in range(1, K):
            s = s + u[i]
        inv_s = 1.0 / s                               # exact: div is free here
        for i in range(K):
            out_ref[0, i] = (u[i] * inv_s).astype(out_ref.dtype)
    else:  # dampster
        # prior normalization cancels; current normalization does not.
        qs = q[0]
        for j in range(1, K):
            qs = qs + q[j]
        inv_qs = 1.0 / qs
        denom = matvec(p, transpose=True)             # denom[j] = Σ_k C[k,j] p[k]
        qd = [q[j] * inv_qs / denom[j] for j in range(K)]
        num = matvec(qd)
        for i in range(K):
            out_ref[0, i] = (p[i] * num[i]).astype(out_ref.dtype)


def _fusion_kernel_mxu_bayes(cm_ref, prior_ref, current_ref, out_ref):
    """cm_ref: VMEM (K, K) f32; prior/current/out refs: VMEM (1, K, TM)."""
    p = prior_ref[0].astype(jnp.float32)      # (K, TM)
    q = current_ref[0].astype(jnp.float32)    # (K, TM)
    c = cm_ref[...]
    u = p * jnp.dot(c, q, preferred_element_type=jnp.float32)
    out_ref[0] = (u / jnp.sum(u, axis=0, keepdims=True)).astype(out_ref.dtype)


def _fusion_kernel_mxu_dampster(cm_ref, cmt_ref, prior_ref, current_ref, out_ref):
    """cm/cmt refs: VMEM (K, K) f32 (cmt = C^T, pre-transposed in the wrapper)."""
    p = prior_ref[0].astype(jnp.float32)      # (K, TM)
    q = current_ref[0].astype(jnp.float32)    # (K, TM)
    c = cm_ref[...]
    ct = cmt_ref[...]
    qn = q / jnp.sum(q, axis=0, keepdims=True)
    denom = jnp.dot(ct, p, preferred_element_type=jnp.float32)
    out_ref[0] = (p * jnp.dot(c, qn / denom, preferred_element_type=jnp.float32)
                  ).astype(out_ref.dtype)


def effective_probability(prior, current, confusion_matrix,
                          fusion_type="bayes", *,
                          target_tile_bytes=2 << 20,
                          output_layout="rows",
                          out_dtype=None):
    """prior/current: [B, K, H, W] (NCHW) or [N, K].

    output_layout="rows"     -> [B*H*W, K] (or [N, K]) like the torch module.
    output_layout="channels" -> [B, K, H*W] (or [K, N]); skips the final HBM
                                transpose when the consumer is channel-major.
    """
    if fusion_type not in ("bayes", "dampster"):
        raise ValueError("select fusion_type as bayes or dampster")
    if output_layout not in ("rows", "channels"):
        raise ValueError("output_layout must be 'rows' or 'channels'")
    K = confusion_matrix.shape[0]
    assert confusion_matrix.shape == (K, K)
    assert prior.ndim in (2, 4) and prior.shape == current.shape
    assert prior.shape[1] == K

    io_dtype = prior.dtype
    out_dtype = io_dtype if out_dtype is None else out_dtype
    itemsize = jnp.dtype(io_dtype).itemsize
    is_4d = (prior.ndim == 4)

    if is_4d:
        B = prior.shape[0]
        hw = prior.shape[2] * prior.shape[3]
        # NCHW stays as-is: free reshape keeps K channel-major and pixels on
        # dense (sublane, lane) planes -- no input transpose / extra HBM pass.
        p3 = prior.reshape(B, K, hw)
        c3 = current.reshape(B, K, hw)
    else:
        B, hw = 1, prior.shape[0]
        # One transpose into the channel-major layout (single extra HBM pass;
        # unavoidable for lane-dense compute when K << 128).
        p3 = jnp.transpose(prior, (1, 0))[None]
        c3 = jnp.transpose(current, (1, 0))[None]

    prefer_even = (B == 1)                    # balance v7x's 2 TensorCores
    target_tile_bytes = min(int(target_tile_bytes), 4 << 20)

    if K <= _SMALL_K_MAX:
        # ---- dense-plane layout: (B, K, hw/128, 128), block (1, K, TS, 128)
        hw128 = -(-hw // 128) * 128
        n128 = hw128 // 128
        ts_target = max(8, target_tile_bytes // (K * 128 * itemsize))
        ts, n_tiles, n128_pad = _pick_tile(n128, ts_target, 8, prefer_even)
        hw_pad = n128_pad * 128
        if hw_pad != hw:
            # pad value 1.0 keeps the dampster denominator non-zero; padded
            # columns are sliced off below.
            pad = hw_pad - hw
            p3 = jnp.pad(p3, ((0, 0), (0, 0), (0, pad)), constant_values=1.0)
            c3 = jnp.pad(c3, ((0, 0), (0, 0), (0, pad)), constant_values=1.0)
        p4 = p3.reshape(B, K, n128_pad, 128)
        c4 = c3.reshape(B, K, n128_pad, 128)

        # (For v7x one could add pipeline_mode=pl.Buffered(3) on the inputs;
        # left at the default depth to keep buffered VMEM modest everywhere.)
        row_spec = pl.BlockSpec((1, K, ts, 128), lambda b, m: (b, 0, m, 0))
        io_tile = K * ts * 128 * itemsize
        vmem_est = 6 * io_tile + 4 * K * ts * 128 * 4

        kernel = functools.partial(_fusion_kernel_smallk,
                                   n_classes=K, fusion_type=fusion_type)
        cm_flat = confusion_matrix.astype(jnp.float32).reshape(-1)  # SMEM scalars
        out4 = pl.pallas_call(
            kernel,
            out_shape=jax.ShapeDtypeStruct((B, K, n128_pad, 128), out_dtype),
            grid=(B, n_tiles),
            in_specs=[
                pl.BlockSpec(memory_space=pltpu.MemorySpace.SMEM),  # C scalars
                row_spec,   # prior planes
                row_spec,   # current planes
            ],
            out_specs=row_spec,
            compiler_params=_compiler_params(vmem_est),
        )(cm_flat, p4, c4)
        out3 = out4.reshape(B, K, hw_pad)
    else:
        # ---- MXU path: block (1, K, TM); one small jnp.dot per tile (the
        # kernel is HBM-bound -- no attempt to pad K for MXU occupancy).
        tm_target = max(128, target_tile_bytes // (K * itemsize))
        tm, n_tiles, hw_pad = _pick_tile(hw, tm_target, 128, prefer_even)
        if hw_pad != hw:
            pad = hw_pad - hw
            p3 = jnp.pad(p3, ((0, 0), (0, 0), (0, pad)), constant_values=1.0)
            c3 = jnp.pad(c3, ((0, 0), (0, 0), (0, pad)), constant_values=1.0)

        row_spec = pl.BlockSpec((1, K, tm), lambda b, m: (b, 0, m))
        cm_spec = pl.BlockSpec((K, K), lambda b, m: (0, 0))
        io_tile = K * tm * itemsize
        vmem_est = 6 * io_tile + 5 * K * tm * 4 + 4 * K * K * 4

        cm_f32 = confusion_matrix.astype(jnp.float32)
        if fusion_type == "bayes":
            args = (cm_f32, p3, c3)                    # no unused C^T DMA
            in_specs = [cm_spec, row_spec, row_spec]
            kernel = _fusion_kernel_mxu_bayes
        else:
            args = (cm_f32, cm_f32.T, p3, c3)
            in_specs = [cm_spec, cm_spec, row_spec, row_spec]
            kernel = _fusion_kernel_mxu_dampster
        out3 = pl.pallas_call(
            kernel,
            out_shape=jax.ShapeDtypeStruct((B, K, hw_pad), out_dtype),
            grid=(B, n_tiles),
            in_specs=in_specs,
            out_specs=row_spec,
            compiler_params=_compiler_params(vmem_est),
        )(*args)

    if hw_pad != hw:
        out3 = out3[:, :, :hw]

    if output_layout == "channels":
        return out3 if is_4d else out3[0]
    if is_4d:
        return jnp.transpose(out3, (0, 2, 1)).reshape(B * hw, K)
    return jnp.transpose(out3[0], (1, 0))


def _reference(prior, current, cm, fusion_type="bayes"):
    """Plain-JAX reference of the efprob math."""
    if prior.ndim == 4:
        K = cm.shape[0]
        prior = jnp.transpose(prior, (0, 2, 3, 1)).reshape(-1, K)
        current = jnp.transpose(current, (0, 2, 3, 1)).reshape(-1, K)
    p = prior / prior.sum(axis=1, keepdims=True)
    q = current / current.sum(axis=1, keepdims=True)
    if fusion_type == "bayes":
        u = p * (q @ cm.T)
        return u / u.sum(axis=1, keepdims=True)
    denom = p @ cm
    return p * ((q / denom) @ cm.T)


if __name__ == "__main__":
    key = jax.random.PRNGKey(0)
    B, K, H, W = 2, 4, 16, 16

    confusion_matrix = (0.7 * jnp.eye(K, dtype=jnp.float32)
                        + 0.3 / K * jnp.ones((K, K), jnp.float32))
    k1, k2, k3, k4 = jax.random.split(key, 4)
    prior = jax.random.uniform(k1, (B, K, H, W), jnp.float32, 0.05, 1.0)
    current = jax.random.uniform(k2, (B, K, H, W), jnp.float32, 0.05, 1.0)

    # --- bayes, 4-D NCHW path (small-K dense-plane kernel)
    out = jax.block_until_ready(
        effective_probability(prior, current, confusion_matrix, "bayes"))
    ref = _reference(prior, current, confusion_matrix, "bayes")
    assert out.shape == (B * H * W, K)
    assert jnp.allclose(out, ref, atol=2e-3, rtol=2e-2)
    assert jnp.allclose(out.sum(axis=1), 1.0, atol=1e-3)

    # --- channel-major output (no final permute) matches the row layout
    out_ch = jax.block_until_ready(
        effective_probability(prior, current, confusion_matrix, "bayes",
                              output_layout="channels"))
    assert out_ch.shape == (B, K, H * W)
    assert jnp.allclose(jnp.transpose(out_ch, (0, 2, 1)).reshape(-1, K), out,
                        atol=1e-5, rtol=1e-5)

    # --- dampster, 2-D input path (same small-K kernel)
    prior2d = jnp.transpose(prior, (0, 2, 3, 1)).reshape(-1, K)
    current2d = jnp.transpose(current, (0, 2, 3, 1)).reshape(-1, K)
    out_d = jax.block_until_ready(
        effective_probability(prior2d, current2d, confusion_matrix, "dampster"))
    ref_d = _reference(prior, current, confusion_matrix, "dampster")
    assert out_d.shape == (B * H * W, K)
    assert jnp.allclose(out_d, ref_d, atol=2e-3, rtol=2e-2)

    # --- larger-K (MXU) path, both fusion types
    K2 = 48
    cm2 = (0.6 * jnp.eye(K2, dtype=jnp.float32)
           + 0.4 / K2 * jnp.ones((K2, K2), jnp.float32))
    prior_l = jax.random.uniform(k3, (1, K2, 16, 16), jnp.float32, 0.05, 1.0)
    current_l = jax.random.uniform(k4, (1, K2, 16, 16), jnp.float32, 0.05, 1.0)
    out_lb = jax.block_until_ready(
        effective_probability(prior_l, current_l, cm2, "bayes"))
    assert jnp.allclose(out_lb, _reference(prior_l, current_l, cm2, "bayes"),
                        atol=2e-3, rtol=2e-2)
    out_ld = jax.block_until_ready(
        effective_probability(prior_l, current_l, cm2, "dampster"))
    assert jnp.allclose(out_ld, _reference(prior_l, current_l, cm2, "dampster"),
                        atol=2e-3, rtol=2e-2)

    print("KERNEL_OK")
</pallas_src>

<mosaic_0001>
module attributes {stable_mosaic.version = 11 : i64} {
  func.func @_fusion_kernel_smallk(%arg0: i32, %arg1: i32, %arg2: memref<16xf32, #tpu.memory_space<smem>>, %arg3: memref<1x4x2x128xf32, #tpu.memory_space<vmem>>, %arg4: memref<1x4x2x128xf32, #tpu.memory_space<vmem>>, %arg5: memref<1x4x2x128xf32, #tpu.memory_space<vmem>>) attributes {dimension_semantics = [#tpu.dimension_semantics<parallel>, #tpu.dimension_semantics<parallel>], iteration_bounds = array<i64: 2, 1>, scalar_prefetch = 0 : i64, scratch_operands = 0 : i64, tpu.core_type = #tpu.core_type<tc>, window_params = [{transform_indices = @transform_0, window_bounds = array<i64: 16>}, {transform_indices = @transform_1, window_bounds = array<i64: 1, 4, 2, 128>}, {transform_indices = @transform_2, window_bounds = array<i64: 1, 4, 2, 128>}, {transform_indices = @transform_3, window_bounds = array<i64: 1, 4, 2, 128>}]} {
    %c0 = arith.constant 0 : index
    %c0_0 = arith.constant 0 : index
    %c0_1 = arith.constant 0 : index
    %c0_2 = arith.constant 0 : index
    %0 = vector.load %arg3[%c0, %c0_0, %c0_1, %c0_2] : memref<1x4x2x128xf32, #tpu.memory_space<vmem>>, vector<1x1x2x128xf32>
    %1 = vector.shape_cast %0 : vector<1x1x2x128xf32> to vector<2x128xf32>
    %c0_3 = arith.constant 0 : index
    %c1 = arith.constant 1 : index
    %c0_4 = arith.constant 0 : index
    %c0_5 = arith.constant 0 : index
    %2 = vector.load %arg3[%c0_3, %c1, %c0_4, %c0_5] : memref<1x4x2x128xf32, #tpu.memory_space<vmem>>, vector<1x1x2x128xf32>
    %3 = vector.shape_cast %2 : vector<1x1x2x128xf32> to vector<2x128xf32>
    %c0_6 = arith.constant 0 : index
    %c2 = arith.constant 2 : index
    %c0_7 = arith.constant 0 : index
    %c0_8 = arith.constant 0 : index
    %4 = vector.load %arg3[%c0_6, %c2, %c0_7, %c0_8] : memref<1x4x2x128xf32, #tpu.memory_space<vmem>>, vector<1x1x2x128xf32>
    %5 = vector.shape_cast %4 : vector<1x1x2x128xf32> to vector<2x128xf32>
    %c0_9 = arith.constant 0 : index
    %c3 = arith.constant 3 : index
    %c0_10 = arith.constant 0 : index
    %c0_11 = arith.constant 0 : index
    %6 = vector.load %arg3[%c0_9, %c3, %c0_10, %c0_11] : memref<1x4x2x128xf32, #tpu.memory_space<vmem>>, vector<1x1x2x128xf32>
    %7 = vector.shape_cast %6 : vector<1x1x2x128xf32> to vector<2x128xf32>
    %c0_12 = arith.constant 0 : index
    %c0_13 = arith.constant 0 : index
    %c0_14 = arith.constant 0 : index
    %c0_15 = arith.constant 0 : index
    %8 = vector.load %arg4[%c0_12, %c0_13, %c0_14, %c0_15] : memref<1x4x2x128xf32, #tpu.memory_space<vmem>>, vector<1x1x2x128xf32>
    %9 = vector.shape_cast %8 : vector<1x1x2x128xf32> to vector<2x128xf32>
    %c0_16 = arith.constant 0 : index
    %c1_17 = arith.constant 1 : index
    %c0_18 = arith.constant 0 : index
    %c0_19 = arith.constant 0 : index
    %10 = vector.load %arg4[%c0_16, %c1_17, %c0_18, %c0_19] : memref<1x4x2x128xf32, #tpu.memory_space<vmem>>, vector<1x1x2x128xf32>
    %11 = vector.shape_cast %10 : vector<1x1x2x128xf32> to vector<2x128xf32>
    %c0_20 = arith.constant 0 : index
    %c2_21 = arith.constant 2 : index
    %c0_22 = arith.constant 0 : index
    %c0_23 = arith.constant 0 : index
    %12 = vector.load %arg4[%c0_20, %c2_21, %c0_22, %c0_23] : memref<1x4x2x128xf32, #tpu.memory_space<vmem>>, vector<1x1x2x128xf32>
    %13 = vector.shape_cast %12 : vector<1x1x2x128xf32> to vector<2x128xf32>
    %c0_24 = arith.constant 0 : index
    %c3_25 = arith.constant 3 : index
    %c0_26 = arith.constant 0 : index
    %c0_27 = arith.constant 0 : index
    %14 = vector.load %arg4[%c0_24, %c3_25, %c0_26, %c0_27] : memref<1x4x2x128xf32, #tpu.memory_space<vmem>>, vector<1x1x2x128xf32>
    %15 = vector.shape_cast %14 : vector<1x1x2x128xf32> to vector<2x128xf32>
    %c0_28 = arith.constant 0 : index
    %16 = memref.load %arg2[%c0_28] : memref<16xf32, #tpu.memory_space<smem>>
    %17 = vector.broadcast %16 : f32 to vector<2x128xf32>
    %18 = arith.mulf %17, %9 : vector<2x128xf32>
    %c1_29 = arith.constant 1 : index
    %19 = memref.load %arg2[%c1_29] : memref<16xf32, #tpu.memory_space<smem>>
    %20 = vector.broadcast %19 : f32 to vector<2x128xf32>
    %21 = arith.mulf %20, %11 : vector<2x128xf32>
    %22 = arith.addf %18, %21 : vector<2x128xf32>
    %c2_30 = arith.constant 2 : index
    %23 = memref.load %arg2[%c2_30] : memref<16xf32, #tpu.memory_space<smem>>
    %24 = vector.broadcast %23 : f32 to vector<2x128xf32>
    %25 = arith.mulf %24, %13 : vector<2x128xf32>
    %26 = arith.addf %22, %25 : vector<2x128xf32>
    %c3_31 = arith.constant 3 : index
    %27 = memref.load %arg2[%c3_31] : memref<16xf32, #tpu.memory_space<smem>>
    %28 = vector.broadcast %27 : f32 to vector<2x128xf32>
    %29 = arith.mulf %28, %15 : vector<2x128xf32>
    %30 = arith.addf %26, %29 : vector<2x128xf32>
    %c4 = arith.constant 4 : index
    %31 = memref.load %arg2[%c4] : memref<16xf32, #tpu.memory_space<smem>>
    %32 = vector.broadcast %31 : f32 to vector<2x128xf32>
    %33 = arith.mulf %32, %9 : vector<2x128xf32>
    %c5 = arith.constant 5 : index
    %34 = memref.load %arg2[%c5] : memref<16xf32, #tpu.memory_space<smem>>
    %35 = vector.broadcast %34 : f32 to vector<2x128xf32>
    %36 = arith.mulf %35, %11 : vector<2x128xf32>
    %37 = arith.addf %33, %36 : vector<2x128xf32>
    %c6 = arith.constant 6 : index
    %38 = memref.load %arg2[%c6] : memref<16xf32, #tpu.memory_space<smem>>
    %39 = vector.broadcast %38 : f32 to vector<2x128xf32>
    %40 = arith.mulf %39, %13 : vector<2x128xf32>
    %41 = arith.addf %37, %40 : vector<2x128xf32>
    %c7 = arith.constant 7 : index
    %42 = memref.load %arg2[%c7] : memref<16xf32, #tpu.memory_space<smem>>
    %43 = vector.broadcast %42 : f32 to vector<2x128xf32>
    %44 = arith.mulf %43, %15 : vector<2x128xf32>
    %45 = arith.addf %41, %44 : vector<2x128xf32>
    %c8 = arith.constant 8 : index
    %46 = memref.load %arg2[%c8] : memref<16xf32, #tpu.memory_space<smem>>
    %47 = vector.broadcast %46 : f32 to vector<2x128xf32>
    %48 = arith.mulf %47, %9 : vector<2x128xf32>
    %c9 = arith.constant 9 : index
    %49 = memref.load %arg2[%c9] : memref<16xf32, #tpu.memory_space<smem>>
    %50 = vector.broadcast %49 : f32 to vector<2x128xf32>
    %51 = arith.mulf %50, %11 : vector<2x128xf32>
    %52 = arith.addf %48, %51 : vector<2x128xf32>
    %c10 = arith.constant 10 : index
    %53 = memref.load %arg2[%c10] : memref<16xf32, #tpu.memory_space<smem>>
    %54 = vector.broadcast %53 : f32 to vector<2x128xf32>
    %55 = arith.mulf %54, %13 : vector<2x128xf32>
    %56 = arith.addf %52, %55 : vector<2x128xf32>
    %c11 = arith.constant 11 : index
    %57 = memref.load %arg2[%c11] : memref<16xf32, #tpu.memory_space<smem>>
    %58 = vector.broadcast %57 : f32 to vector<2x128xf32>
    %59 = arith.mulf %58, %15 : vector<2x128xf32>
    %60 = arith.addf %56, %59 : vector<2x128xf32>
    %c12 = arith.constant 12 : index
    %61 = memref.load %arg2[%c12] : memref<16xf32, #tpu.memory_space<smem>>
    %62 = vector.broadcast %61 : f32 to vector<2x128xf32>
    %63 = arith.mulf %62, %9 : vector<2x128xf32>
    %c13 = arith.constant 13 : index
    %64 = memref.load %arg2[%c13] : memref<16xf32, #tpu.memory_space<smem>>
    %65 = vector.broadcast %64 : f32 to vector<2x128xf32>
    %66 = arith.mulf %65, %11 : vector<2x128xf32>
    %67 = arith.addf %63, %66 : vector<2x128xf32>
    %c14 = arith.constant 14 : index
    %68 = memref.load %arg2[%c14] : memref<16xf32, #tpu.memory_space<smem>>
    %69 = vector.broadcast %68 : f32 to vector<2x128xf32>
    %70 = arith.mulf %69, %13 : vector<2x128xf32>
    %71 = arith.addf %67, %70 : vector<2x128xf32>
    %c15 = arith.constant 15 : index
    %72 = memref.load %arg2[%c15] : memref<16xf32, #tpu.memory_space<smem>>
    %73 = vector.broadcast %72 : f32 to vector<2x128xf32>
    %74 = arith.mulf %73, %15 : vector<2x128xf32>
    %75 = arith.addf %71, %74 : vector<2x128xf32>
    %76 = arith.mulf %1, %30 : vector<2x128xf32>
    %77 = arith.mulf %3, %45 : vector<2x128xf32>
    %78 = arith.mulf %5, %60 : vector<2x128xf32>
    %79 = arith.mulf %7, %75 : vector<2x128xf32>
    %80 = arith.addf %76, %77 : vector<2x128xf32>
    %81 = arith.addf %80, %78 : vector<2x128xf32>
    %82 = arith.addf %81, %79 : vector<2x128xf32>
    %cst = arith.constant 1.000000e+00 : f32
    %83 = vector.broadcast %cst : f32 to vector<2x128xf32>
    %84 = arith.divf %83, %82 : vector<2x128xf32>
    %85 = arith.mulf %76, %84 : vector<2x128xf32>
    %c0_32 = arith.constant 0 : index
    %c0_33 = arith.constant 0 : index
    %c0_34 = arith.constant 0 : index
    %c0_35 = arith.constant 0 : index
    %86 = vector.load %arg5[%c0_32, %c0_33, %c0_34, %c0_35] : memref<1x4x2x128xf32, #tpu.memory_space<vmem>>, vector<1x1x2x128xf32>
    %87 = vector.shape_cast %86 : vector<1x1x2x128xf32> to vector<2x128xf32>
    %88 = vector.shape_cast %85 : vector<2x128xf32> to vector<1x1x2x128xf32>
    tpu.vector_store %arg5[%c0_32, %c0_33, %c0_34, %c0_35], %88 {strides = array<i32>} : memref<1x4x2x128xf32, #tpu.memory_space<vmem>>, vector<1x1x2x128xf32>,
    %89 = arith.mulf %77, %84 : vector<2x128xf32>
    %c0_36 = arith.constant 0 : index
    %c1_37 = arith.constant 1 : index
    %c0_38 = arith.constant 0 : index
    %c0_39 = arith.constant 0 : index
    %90 = vector.load %arg5[%c0_36, %c1_37, %c0_38, %c0_39] : memref<1x4x2x128xf32, #tpu.memory_space<vmem>>, vector<1x1x2x128xf32>
    %91 = vector.shape_cast %90 : vector<1x1x2x128xf32> to vector<2x128xf32>
    %92 = vector.shape_cast %89 : vector<2x128xf32> to vector<1x1x2x128xf32>
    tpu.vector_store %arg5[%c0_36, %c1_37, %c0_38, %c0_39], %92 {strides = array<i32>} : memref<1x4x2x128xf32, #tpu.memory_space<vmem>>, vector<1x1x2x128xf32>,
    %93 = arith.mulf %78, %84 : vector<2x128xf32>
    %c0_40 = arith.constant 0 : index
    %c2_41 = arith.constant 2 : index
    %c0_42 = arith.constant 0 : index
    %c0_43 = arith.constant 0 : index
    %94 = vector.load %arg5[%c0_40, %c2_41, %c0_42, %c0_43] : memref<1x4x2x128xf32, #tpu.memory_space<vmem>>, vector<1x1x2x128xf32>
    %95 = vector.shape_cast %94 : vector<1x1x2x128xf32> to vector<2x128xf32>
    %96 = vector.shape_cast %93 : vector<2x128xf32> to vector<1x1x2x128xf32>
    tpu.vector_store %arg5[%c0_40, %c2_41, %c0_42, %c0_43], %96 {strides = array<i32>} : memref<1x4x2x128xf32, #tpu.memory_space<vmem>>, vector<1x1x2x128xf32>,
    %97 = arith.mulf %79, %84 : vector<2x128xf32>
    %c0_44 = arith.constant 0 : index
    %c3_45 = arith.constant 3 : index
    %c0_46 = arith.constant 0 : index
    %c0_47 = arith.constant 0 : index
    %98 = vector.load %arg5[%c0_44, %c3_45, %c0_46, %c0_47] : memref<1x4x2x128xf32, #tpu.memory_space<vmem>>, vector<1x1x2x128xf32>
    %99 = vector.shape_cast %98 : vector<1x1x2x128xf32> to vector<2x128xf32>
    %100 = vector.shape_cast %97 : vector<2x128xf32> to vector<1x1x2x128xf32>
    tpu.vector_store %arg5[%c0_44, %c3_45, %c0_46, %c0_47], %100 {strides = array<i32>} : memref<1x4x2x128xf32, #tpu.memory_space<vmem>>, vector<1x1x2x128xf32>,
    return
  }
  func.func @transform_0(%arg0: i32, %arg1: i32) -> i32 {
    %c0_i32 = arith.constant 0 : i32
    %c0_i32_0 = arith.constant 0 : i32
    return %c0_i32 : i32
  }
  func.func @transform_1(%arg0: i32, %arg1: i32) -> (i32, i32, i32, i32) {
    %c0_i32 = arith.constant 0 : i32
    %c0_i32_0 = arith.constant 0 : i32
    %c0_i32_1 = arith.constant 0 : i32
    return %arg0, %c0_i32, %arg1, %c0_i32_0 : i32, i32, i32, i32
  }
  func.func @transform_2(%arg0: i32, %arg1: i32) -> (i32, i32, i32, i32) {
    %c0_i32 = arith.constant 0 : i32
    %c0_i32_0 = arith.constant 0 : i32
    %c0_i32_1 = arith.constant 0 : i32
    return %arg0, %c0_i32, %arg1, %c0_i32_0 : i32, i32, i32, i32
  }
  func.func @transform_3(%arg0: i32, %arg1: i32) -> (i32, i32, i32, i32) {
    %c0_i32 = arith.constant 0 : i32
    %c0_i32_0 = arith.constant 0 : i32
    %c0_i32_1 = arith.constant 0 : i32
    return %arg0, %c0_i32, %arg1, %c0_i32_0 : i32, i32, i32, i32
  }
}

</mosaic_0001>

<bundles_post_ra>
// kernel: tpu_custom_call.1
= control target key start
LH: loop header
LB: loop body
LE: loop exit
PB: predicated region body
PF: predicated region fallthrough
CT: control target
= control target key end

     0   :  { %s1105_s0 = inlined_call_operand.hbm [shape: f32[16], index: 0, kind: input, shape index: {}]   ;;  %s1106_s1 = inlined_call_operand.hbm [shape: f32[2,4,2,128], index: 1, kind: input, shape index: {}]   ;;  %s1107_s2 = inlined_call_operand.hbm [shape: f32[2,4,2,128], index: 2, kind: input, shape index: {}]   ;;  %s1108_s3 = inlined_call_operand.hbm [shape: f32[2,4,2,128], index: 3, kind: output, shape index: {}]  }
   0x1   :  { %1113 = sst [smem:[#allocation14_spill]] %s1105_s0 }
   0x2   :  { %1114 = sst [smem:[#allocation15_spill]] %s1106_s1 }
   0x3   :  { %1115 = sst [smem:[#allocation16_spill]] %s1107_s2 }
   0x4   :  { %8 = vsyncpa [#allocation5], 0 }
   0x5   :  { %9 = vsyncpa [#allocation3], 0 }
   0x6   :  { %11 = vsyncpa [#allocation3 + $0x1], 0 }
   0x7   :  { %12 = vsyncpa [#allocation8], 0 }
   0x8   :  { %14 = vsyncpa [#allocation8 + $0x1], 0 }
   0x9   :  { %15 = vsyncpa [#allocation4], 0 }
   0xa   :  { %17 = vsyncpa [#allocation4 + $0x1], 0  ;;  %s817_s12 = smov 0   ;;  %s819_s13 = smov 0  }
   0xb   :  { %s821_s14 = smov 0   ;;  %s823_s15 = smov 0  }
   0xc   :  { %s825_s16 = smov 0   ;;  %s827_s17 = smov 0  }
   0xd LB: > { %s492_s18 = sadd.s32 4294967295, %s787_s17   ;;  %s493_s19 = sadd.s32 4294967294, %s787_s17   ;;  %s787_s17 = sphi %s827_s17, %s23_s17   ;;  %s783_s16 = sphi %s825_s16, %s1134_s16   ;;  %s779_s15 = sphi %s823_s15, %s1133_s15   ;;  %s775_s14 = sphi %s821_s14, %s1132_s14   ;;  %s771_s13 = sphi %s819_s13, %s1131_s13   ;;  %s767_s12 = sphi %s817_s12, %s1130_s12  }
   0xe   : > { %s65_s20 = sadd.s32 1, %s775_s14  ;;  %p72_p0 = scmp.ne.s32.totalorder %s775_s14, %s771_s13 }
   0xf   : > { %p73_p1 = scmp.eq.s32.totalorder %s787_s17, 0  ;;  %p78_p2 = scmp.ne.s32.totalorder %s771_s13, %s767_s12 }
  0x10   : > { %p855_p3 = scmp.eq.s32.totalorder %s492_s18, 0  ;;  %p132_p4 = scmp.eq.s32.totalorder %s492_s18, 1 }
  0x11   : > { %p74_p5 = por %p73_p1, %p72_p0  ;;  %p138_p6 = scmp.eq.s32.totalorder %s493_s19, 1 }
  0x12   : > { %s1116_s21 = scalar_select %p855_p3, 1, 0 }
  0x13   : > { %p861_p7 = por %p855_p3, %p78_p2  ;;  %p865_p8 = por %p132_p4, %p72_p0 }
  0x14   : > { %p869_p9 = por %p138_p6, %p78_p2  ;;  %p494_p10 = scmp.ge.s32.totalorder %s787_s17, 1 }
  0x15   : > { %s1117_s22 = scalar_select %p861_p7, 1, 0 }
  0x16   : > { %s1118_s23 = scalar_select %p865_p8, 1, 0 }
  0x17   : > { %s1119_s24 = scalar_select %p869_p9, 1, 0 }
  0x18   : > { %p145_p11 = scmp.lt.s32.totalorder %s787_s17, 3  ;;  %p566_p1 = scmp.lt.s32.totalorder %s787_s17, 2 }
  0x19   : > { %s882_s26 = sand.u32 1, %s775_s14   ;;  %s35_s28 = sadd.s32 1, %s783_s16 }
  0x1a   : > { %p876_p13 = pnand %p494_p10, %p145_p11  ;;  %p886_p4 = pnand %p566_p1, %p74_p5 }
  0x1b   : > { %s497_s29 = sshll.u32 %s882_s26, 3  ;;  %p37_p6 = scmp.ge.s32.totalorder %s35_s28, 2 }
  0x1c   : > { %p550_p0 = pneg %p876_p13  ;;  %s1122_s0 = sld [smem:[#allocation14_spill]] }
  0x1e   : > { %p551_p2 = pnand %p550_p0, %p855_p3 }
  0x20   : > { %p626_p11 = pneg %p551_p2 }
  0x22   : > { %s624_s5 = scalar_lea.hbm %s1122_s0, 16 }
  0x23   : > { %p625_p10 = scmp.ne.s32.totalorder %s1122_s0, %s624_s5  ;;  %p631_p5 = scmp.lt.u32.totalorder %s624_s5, %s1122_s0 }
  0x25   : > { %p627_p12 = pnand %p626_p11, %p625_p10 }
  0x27   : > { %p628_p9 = pneg %p627_p12 }
  0x29   : > { %p633_p1 = pnand %p631_p5, %p628_p9 }
  0x2b   : > { %636 = shalt.err (!%p633_p1)
}
  0x2c   : > { %s789_s10 = smov [#allocation2]   ;;  %s1136_s28 = smov (%p37_p6, %s35_s28), 0 }
  0x2d   : > { %553 = dma.hbm_to_smem (!%p551_p2), %s1122_s0, 16, %s789_s10, [#allocation5]  }
  0x2e   : > { %s537_s19 = sshll.u32 %s783_s16, 7  ;;  %s60_s30 = ssub.s32 %s783_s16, %s1136_s28 }
  0x2f   : > { %s1123_s1 = sld [smem:[#allocation15_spill]]  ;;  %p63_p9 = scmp.eq.s32.totalorder %s60_s30, 0 }
  0x30   : > { %s171_s7 = scalar_lea.vmem [#allocation6], %s497_s29  ;;  %s168_s10 = scalar_lea.sflag [#allocation3], %s882_s26 }
  0x31   : > { %s179_s8 = sshll.u32 %s171_s7, 4  ;;  %p639_p0 = pneg %p886_p4  ;;  %s920_s8 = int_to_ptr.vmem [resolvable:$true] %s179_s8 }
  0x32   : > { %s925_s9 = scalar_select %p63_p9, %s775_s14, %s65_s20  }
  0x35   : > { %s916_s6 = scalar_lea.hbm %s1123_s1, %s537_s19  ;;  %s642_s30 = scalar_lea.hbm %s1123_s1, 256 }
  0x36   : > { %s637_s11 = scalar_lea.hbm %s916_s6, 128  ;;  %p643_p10 = scmp.lt.u32.totalorder %s916_s6, %s1123_s1 }
  0x37   : > { %p638_p12 = scmp.ne.s32.totalorder %s916_s6, %s637_s11  ;;  %p644_p11 = scmp.lt.u32.totalorder %s642_s30, %s637_s11 }
  0x38   : > { %p646_p1 = scmp.lt.u32.totalorder %s637_s11, %s916_s6 }
  0x39   : > { %p640_p2 = pnand %p639_p0, %p638_p12  ;;  %p645_p5 = por %p644_p11, %p643_p10 }
  0x3b   : > { %p641_p6 = pneg %p640_p2  ;;  %p647_p9 = por %p646_p1, %p645_p5 }
  0x3d   : > { %p648_p8 = pnand %p647_p9, %p641_p6 }
  0x3f   : > { %651 = shalt.err (!%p648_p8)
}
  0x40   : > { %s652_s20 = scalar_lea.vmem %s920_s8, 128  ;;  %s790_s18 = smov [#allocation6]  }
  0x41   : > { %p653_p12 = scmp.ne.s32.totalorder %s920_s8, %s652_s20  ;;  %s657_s4 = sshll.u32 %s790_s18, 4  ;;  %s658_s4 = int_to_ptr.vmem [resolvable:$false] %s657_s4 }
  0x42   : > { %s659_s5 = scalar_lea.vmem %s658_s4, 256  ;;  %p660_p3 = scmp.lt.s32.totalorder %s920_s8, %s658_s4 }
  0x43   : > { %p655_p2 = pnand %p653_p12, %p639_p0  ;;  %p661_p10 = scmp.lt.s32.totalorder %s659_s5, %s652_s20 }
  0x45   : > { %p656_p7 = pneg %p655_p2  ;;  %p662_p11 = por %p661_p10, %p660_p3 }
  0x47   : > { %p663_p5 = pnand %p662_p11, %p656_p7 }
  0x49   : > { %666 = shalt.err (!%p663_p5)
}
  0x4a   : > { %s791_s11 = smov 32   ;;  %s792_s30 = smov 2  }
  0x4b   : > { %557 = dma.hbm_to_vmem [thread:$0]  (!%p886_p4), %s916_s6, 128, %s920_s8, %s168_s10, %s791_s11, %s791_s11, %s792_s30  }
  0x4c   : > { %s1124_s2 = sld [smem:[#allocation16_spill]]  ;;  %s193_s4 = scalar_lea.vmem [#allocation7], %s497_s29 }
  0x4d   : > { %s201_s5 = sshll.u32 %s193_s4, 4  ;;  %s190_s0 = scalar_lea.sflag [#allocation8], %s882_s26  ;;  %s967_s5 = int_to_ptr.vmem [resolvable:$true] %s201_s5 }
  0x52   : > { %s963_s18 = scalar_lea.hbm %s1124_s2, %s537_s19  ;;  %s672_s19 = scalar_lea.hbm %s1124_s2, 256 }
  0x53   : > { %s667_s1 = scalar_lea.hbm %s963_s18, 128  ;;  %p673_p6 = scmp.lt.u32.totalorder %s963_s18, %s1124_s2 }
  0x54   : > { %p668_p3 = scmp.ne.s32.totalorder %s963_s18, %s667_s1  ;;  %p674_p1 = scmp.lt.u32.totalorder %s672_s19, %s667_s1 }
  0x55   : > { %p676_p12 = scmp.lt.u32.totalorder %s667_s1, %s963_s18 }
  0x56   : > { %p670_p7 = pnand %p668_p3, %p639_p0  ;;  %p675_p9 = por %p674_p1, %p673_p6 }
  0x58   : > { %p671_p8 = pneg %p670_p7  ;;  %p677_p2 = por %p676_p12, %p675_p9 }
  0x5a   : > { %p678_p10 = pnand %p677_p2, %p671_p8 }
  0x5c   : > { %681 = shalt.err (!%p678_p10)
}
  0x5d   : > { %s682_s29 = scalar_lea.vmem %s967_s5, 128  ;;  %s793_s20 = smov [#allocation7]  }
  0x5e   : > { %p683_p11 = scmp.ne.s32.totalorder %s967_s5, %s682_s29  ;;  %s687_s4 = sshll.u32 %s793_s20, 4  ;;  %s688_s4 = int_to_ptr.vmem [resolvable:$false] %s687_s4 }
  0x5f   : > { %s689_s6 = scalar_lea.vmem %s688_s4, 256  ;;  %p690_p7 = scmp.lt.s32.totalorder %s967_s5, %s688_s4 }
  0x60   : > { %p685_p5 = pnand %p683_p11, %p639_p0  ;;  %p691_p6 = scmp.lt.s32.totalorder %s689_s6, %s682_s29 }
  0x62   : > { %p686_p3 = pneg %p685_p5  ;;  %p692_p1 = por %p691_p6, %p690_p7 }
  0x64   : > { %p693_p9 = pnand %p692_p1, %p686_p3 }
  0x66   : > { %696 = shalt.err (!%p693_p9)
}
  0x67   : > { %560 = dma.hbm_to_vmem [thread:$0]  (!%p886_p4), %s963_s18, 128, %s967_s5, %s190_s0, %s791_s11, %s791_s11, %s792_s30  }
  0x68   : > { %213 = sbr.rel (%p876_p13) target bundleno = 176 (0xb0), region = 32  ;;  %p1125_p0 = scmp.ne.s32.totalorder (!%p876_p13), %s1116_s21, 0 }
  0x6f   : > { %750 = dma.done.wait (%p1125_p0), [#allocation5], 16  }
  0x70   : > { %752 = vsyncadd (%p1125_p0), [#allocation5], 4294967280  ;;  %s1005_s1 = sand.u32 1, %s771_s13   ;;  %p1126_p4 = scmp.ne.s32.totalorder %s1117_s22, 0 }
  0x71   : > { %s1008_s27 = sshll.u32 %s1005_s1, 3  ;;  %s220_s26 = scalar_lea.sflag [#allocation3], %s1005_s1 }
  0x72   : > { %s1012_s0 = scalar_lea.vmem [#allocation6], %s1008_s27 }
  0x73   : > { %754 = dma.done.wait (%p1126_p4), %s220_s26, 128  }
  0x74   : > { %756 = vsyncadd (%p1126_p4), %s220_s26, 4294967168  ;;  %s229_s21 = scalar_lea.sflag [#allocation8], %s1005_s1  ;;  %s232_s25 = scalar_lea.vmem [#allocation7], %s1008_s27 }
  0x75   : > { %758 = dma.done.wait (%p1126_p4), %s229_s21, 128  }
  0x76   : > { %760 = vsyncadd (%p1126_p4), %s229_s21, 4294967168 }
  0x77   : > { %237 = sfence }
  0x78   : > { %s275_s11 = sld [smem:[#allocation2]]  ;;  %s514_s30 = sld [smem:[#allocation2 + $0x1]]  ;;  %v268_v0 = vld [vmem:[%s232_s25] sm:$0x3]  ;;  %v511_v1 = vld [vmem:[%s232_s25 + $0x2] sm:$0x3] }
  0x79   : > { %s515_s18 = sld [smem:[#allocation2 + $0x2]]  ;;  %s516_s5 = sld [smem:[#allocation2 + $0x3]]  ;;  %v512_v2 = vld [vmem:[%s232_s25 + $0x4] sm:$0x3]  ;;  %v513_v3 = vld [vmem:[%s232_s25 + $0x6] sm:$0x3] }
  0x7a   : > { %s517_s8 = sld [smem:[#allocation2 + $0x4]]  ;;  %s518_s19 = sld [smem:[#allocation2 + $0x5]]  ;;  %v261_v30 = vld [vmem:[%s1012_s0] sm:$0x3]  ;;  %v508_v35 = vld [vmem:[%s1012_s0 + $0x2] sm:$0x3] }
  0x7b   : > { %s519_s10 = sld [smem:[#allocation2 + $0x6]]  ;;  %s1024_s7 = sld [smem:[#allocation2 + $0x7]]  ;;  %v509_v46 = vld [vmem:[%s1012_s0 + $0x4] sm:$0x3]  ;;  %v510_v53 = vld [vmem:[%s1012_s0 + $0x6] sm:$0x3] }
  0x7c   : > { %s521_s29 = sld [smem:[#allocation2 + $0x8]]  ;;  %s522_s20 = sld [smem:[#allocation2 + $0x9]] }
  0x7d   : > { %s1026_s4 = sld [smem:[#allocation2 + $0xa]]  ;;  %s1028_s22 = sld [smem:[#allocation2 + $0xb]] }
  0x7e   : > { %v276_v4 = vstv %s275_s11  ;;  %v279_v5 = vstv %s514_s30  ;;  %s1030_s6 = sld [smem:[#allocation2 + $0xc]]  ;;  %s1032_s26 = sld [smem:[#allocation2 + $0xd]] }
  0x7f   : > { %v277_v6 = vmul.f32 %v276_v4, %v268_v0  ;;  %v280_v7 = vmul.f32 %v511_v1, %v279_v5  ;;  %v283_v8 = vstv %s515_s18  ;;  %v287_v9 = vstv %s516_s5  ;;  %s1034_s21 = sld [smem:[#allocation2 + $0xe]]  ;;  %s1036_s2 = sld [smem:[#allocation2 + $0xf]] }
  0x80   : > { %v284_v10 = vmul.f32 %v512_v2, %v283_v8  ;;  %v288_v11 = vmul.f32 %v513_v3, %v287_v9  ;;  %v291_v12 = vstv %s517_s8  ;;  %v294_v13 = vstv %s518_s19  ;;  %s539_s11 = sshll.u32 %s779_s15, 7  ;;  %s356_s15 = scalar_lea.sflag [#allocation4], %s1005_s1 }
  0x81   : > { %v281_v14 = vadd.f32 %v280_v7, %v277_v6  ;;  %v292_v15 = vmul.f32 %v291_v12, %v268_v0  ;;  %v295_v16 = vmul.f32 %v511_v1, %v294_v13  ;;  %v298_v17 = vstv %s519_s10  ;;  %s1056_s0 = scalar_lea.hbm %s1108_s3, %s539_s11  ;;  %p1127_p8 = scmp.ne.s32.totalorder %s1118_s23, 0 }
  0x82   : > { %v299_v18 = vmul.f32 %v512_v2, %v298_v17  ;;  %v302_v19 = vstv %s1024_s7  ;;  %v306_v20 = vstv %s521_s29  ;;  %v309_v21 = vstv %s522_s20  ;;  %s794_s5 = smov [#allocation9]  }
  0x83   : > { %v285_v22 = vadd.f32 %v284_v10, %v281_v14  ;;  %v296_v23 = vadd.f32 %v295_v16, %v292_v15  ;;  %v303_v24 = vmul.f32 %v513_v3, %v302_v19  ;;  %v307_v25 = vmul.f32 %v306_v20, %v268_v0  ;;  %s701_s8 = sshll.u32 %s794_s5, 4  ;;  %s702_s8 = int_to_ptr.vmem [resolvable:$false] %s701_s8 }
  0x84   : > { %v310_v26 = vmul.f32 %v511_v1, %v309_v21  ;;  %v313_v27 = vstv %s1026_s4  ;;  %v317_v28 = vstv %s1028_s22  ;;  %v321_v29 = vstv %s1030_s6  ;;  %s703_s19 = scalar_lea.vmem %s702_s8, 256 }
  0x85   : > { %v289_v31 = vadd.f32 %v288_v11, %v285_v22  ;;  %v300_v32 = vadd.f32 %v299_v18, %v296_v23  ;;  %v314_v33 = vmul.f32 %v512_v2, %v313_v27  ;;  %v318_v34 = vmul.f32 %v513_v3, %v317_v28 }
  0x86   : > { %v311_v36 = vadd.f32 %v310_v26, %v307_v25  ;;  %v322_v37 = vmul.f32 %v321_v29, %v268_v0  ;;  %v324_v38 = vstv %s1032_s26  ;;  %v328_v39 = vstv %s1034_s21 }
  0x87   : > { %v304_v40 = vadd.f32 %v303_v24, %v300_v32  ;;  %v325_v41 = vmul.f32 %v511_v1, %v324_v38  ;;  %v329_v42 = vmul.f32 %v512_v2, %v328_v39  ;;  %v332_v43 = vstv %s1036_s2  ;;  %s260_s2 = scalar_lea.vmem [#allocation9], %s1008_s27 }
  0x88   : > { %v315_v44 = vadd.f32 %v314_v33, %v311_v36  ;;  %v335_v45 = vmul.f32 %v289_v31, %v261_v30  ;;  %v333_v48 = vmul.f32 %v513_v3, %v332_v43  ;;  %s370_s25 = sshll.u32 %s260_s2, 4  ;;  %s1051_s25 = int_to_ptr.vmem [resolvable:$true] %s370_s25 }
  0x89   : > { %v326_v47 = vadd.f32 %v325_v41, %v322_v37  ;;  %v336_v49 = vmul.f32 %v508_v35, %v304_v40  ;;  %s697_s27 = scalar_lea.vmem %s1051_s25, 128  ;;  %p704_p10 = scmp.lt.s32.totalorder %s1051_s25, %s702_s8 }
  0x8a   : > { %v319_v50 = vadd.f32 %v318_v34, %v315_v44  ;;  %p698_p13 = scmp.ne.s32.totalorder %s1051_s25, %s697_s27  ;;  %p705_p11 = scmp.lt.s32.totalorder %s703_s19, %s697_s27 }
  0x8b   : > { %v330_v51 = vadd.f32 %v329_v42, %v326_v47  ;;  %v339_v52 = vadd.f32 %v336_v49, %v335_v45 }
  0x8c   : > { %v337_v54 = vmul.f32 %v509_v46, %v319_v50  ;;  %p699_p12 = pnand %p698_p13, %p1127_p8  ;;  %p706_p5 = por %p705_p11, %p704_p10 }
  0x8d   : > { %v334_v55 = vadd.f32 %v333_v48, %v330_v51 }
  0x8e   : > { %v340_v56 = vadd.f32 %v339_v52, %v337_v54  ;;  %p700_p2 = pneg %p699_p12 }
  0x8f   : > { %v338_v57 = vmul.f32 %v510_v53, %v334_v55 }
  0x90   : > { %p707_p3 = pnand %p706_p5, %p700_p2 }
  0x91   : > { %v341_v58 = vadd.f32 %v340_v56, %v338_v57 }
  0x93   : > { %622 = vrcp.f32 %v341_v58 }
  0x9d   : > { %v623_v59 = vpop.eup %622 }
  0x9e   : > { %v344_v60 = vmul.f32 %v623_v59, %v335_v45  ;;  %v346_v61 = vmul.f32 %v623_v59, %v336_v49  ;;  %v349_v62 = vmul.f32 %v623_v59, %v337_v54  ;;  %v352_v63 = vmul.f32 %v623_v59, %v338_v57 }
  0xa0   : > { %345 = vst [vmem:[%s260_s2] sm:$0x3] %v344_v60  ;;  %529 = vst [vmem:[%s260_s2 + $0x2] sm:$0x3] %v346_v61 }
  0xa1   : > { %530 = vst [vmem:[%s260_s2 + $0x4] sm:$0x3] %v349_v62  ;;  %531 = vst [vmem:[%s260_s2 + $0x6] sm:$0x3] %v352_v63 }
  0xa2   : > { %710 = shalt.err (!%p707_p3)
}
  0xa3   : > { %s711_s10 = scalar_lea.hbm %s1056_s0, 128  ;;  %s715_s20 = scalar_lea.hbm %s1108_s3, 256 }
  0xa4   : > { %p712_p7 = scmp.ne.s32.totalorder %s1056_s0, %s711_s10  ;;  %p716_p9 = scmp.lt.u32.totalorder %s1056_s0, %s1108_s3 }
  0xa5   : > { %p717_p0 = scmp.lt.u32.totalorder %s715_s20, %s711_s10  ;;  %p719_p13 = scmp.lt.u32.totalorder %s711_s10, %s1056_s0 }
  0xa6   : > { %p713_p6 = pnand %p712_p7, %p1127_p8 }
  0xa7   : > { %p718_p4 = por %p717_p0, %p716_p9 }
  0xa8   : > { %p714_p1 = pneg %p713_p6 }
  0xa9   : > { %p720_p12 = por %p719_p13, %p718_p4 }
  0xab   : > { %p721_p2 = pnand %p720_p12, %p714_p1 }
  0xad   : > { %724 = shalt.err (!%p721_p2)
}
  0xae   : > { %s795_s6 = smov 32   ;;  %s796_s26 = smov 2  }
  0xaf   : > { %548 = dma.vmem_to_hbm [thread:$0]  (%p1127_p8), %s1051_s25, 128, %s1056_s0, %s356_s15, %s795_s6, %s795_s6, %s796_s26  }
  0xb0 PF: > { %s385_s21 = sand.u32 1, %s767_s12   ;;  %p1128_p10 = scmp.ne.s32.totalorder %s1119_s24, 0 }
  0xb1   : > { %p1129_p11 = scmp.ge.s32.totalorder %s787_s17, 2  ;;  %s386_s2 = scalar_lea.sflag [#allocation4], %s385_s21 }
  0xb3   : > { %p562_p5 = pnand %p1129_p11, %p1128_p10 }
  0xb5   : > { %762 = dma.done.wait (!%p562_p5), %s386_s2, 128  }
  0xb6   : > { %764 = vsyncadd (!%p562_p5), %s386_s2, 4294967168  ;;  %s23_s17 = sadd.s32 1, %s787_s17   ;;  %s1130_s12 = smov %s771_s13 }
  0xb7   : > { %p20_p3 = scmp.ge.s32.totalorder %s23_s17, 4   ;;  %s1131_s13 = smov %s775_s14 }
  0xb8   : > { %s1132_s14 = smov %s925_s9  ;;  %s1133_s15 = smov %s783_s16 }
  0xb9   : > { %s1134_s16 = smov %s1136_s28  ;;  %22 = sbr.rel (!%p20_p3) target bundleno = 13 (0xd), region = 104 }
  0xc0   :  { %391 = vsyncpa [#allocation3], 1 }
  0xc1   :  { %393 = vsyncpa [#allocation3 + $0x1], 1 }
  0xc2   :  { %394 = vsyncpa [#allocation8], 1 }
  0xc3   :  { %396 = vsyncpa [#allocation8 + $0x1], 1 }
  0xc4   :  { %397 = vsyncpa [#allocation4], 1 }
  0xc5   :  { %399 = vsyncpa [#allocation4 + $0x1], 1 }
  0xc6   :  { %400 = vsyncpa [#allocation5], 1 }
  0xc7   :  { %402 = vsyncpa [#allocation5 + $0x1], 1 }

</bundles_post_ra>
